<compile_context>
chip_gen: v5e
topology: v5e:2x2
jax: 0.10.0
libtpu: 0.0.40
codegen_flags: <defaults>
</compile_context>

<pallas_src>
import functools

import jax
import jax.numpy as jnp
from jax.experimental import pallas as pl
from jax.experimental.pallas import tpu as pltpu


def _ce_label_smooth_kernel(
    logits_ref, targets_ref, loss_ref, *, epsilon, num_classes, true_b, block_b
):
    # logits_ref: (TB, K) in VMEM (native dtype), targets_ref: (TB, 1) int32,
    # loss_ref: (TB, 1) f32 per-row (masked) partial losses.
    i = pl.program_id(0)

    x = logits_ref[...].astype(jnp.float32)                    # (TB, K)
    tb, k = x.shape

    # Numerically stable log-softmax statistics (no full (TB, K) log_probs).
    m = jnp.max(x, axis=1, keepdims=True)                      # (TB, 1)
    z = x - m                                                  # (TB, K)
    lse = jnp.log(jnp.sum(jnp.exp(z), axis=1, keepdims=True))  # (TB, 1)

    # sum_j log_probs_j = sum_j z_j - K * lse
    sum_z = jnp.sum(z, axis=1, keepdims=True)                  # (TB, 1)
    sum_lp = sum_z - float(k) * lse                            # (TB, 1)

    # log_prob at the target class, without building a one-hot matrix.
    cls_ids = jax.lax.broadcasted_iota(jnp.int32, (tb, k), 1)  # (TB, K)
    tgt = targets_ref[...]                                     # (TB, 1) int32
    z_tgt = jnp.sum(jnp.where(cls_ids == tgt, z, 0.0), axis=1, keepdims=True)
    lp_tgt = z_tgt - lse                                       # (TB, 1)

    per_row = -((1.0 - epsilon) * lp_tgt + (epsilon / num_classes) * sum_lp)

    # Mask rows that are batch padding (global row index >= true batch size).
    row_ids = i * block_b + jax.lax.broadcasted_iota(jnp.int32, (tb, 1), 0)
    per_row = jnp.where(row_ids < true_b, per_row, 0.0)

    loss_ref[...] = per_row


def cross_entropy_loss(
    inputs, targets, *, num_classes, epsilon=0.1, label_smooth=True, block_b=None
):
    """inputs: (B, num_classes) float logits; targets: (B,) int class indices.

    Matches PyTorch: loss = (-smoothed_onehot * log_softmax(inputs)).mean(0).sum()
    """
    eps = float(epsilon) if label_smooth else 0.0
    B, K = inputs.shape
    assert K == num_classes

    # --- batch tile sizing -------------------------------------------------
    # Cap the double-buffered logits tile at ~8 MiB so it fits comfortably in
    # the default scoped VMEM on v5e (16 MiB) / v6e (32 MiB) / v7x (32 MiB).
    bytes_per_elem = jnp.dtype(inputs.dtype).itemsize
    vmem_budget = 8 * 1024 * 1024
    max_tb = max(8, (vmem_budget // (2 * K * bytes_per_elem)) // 8 * 8)
    if block_b is None:
        block_b = 128 if B >= 128 else ((B + 7) // 8) * 8
    block_b = max(8, ((block_b + 7) // 8) * 8)
    block_b = int(min(block_b, max_tb))

    num_tiles = pl.cdiv(B, block_b)
    b_pad = num_tiles * block_b
    if b_pad != B:
        inputs = jnp.pad(inputs, ((0, b_pad - B), (0, 0)))
        targets = jnp.pad(targets, ((0, b_pad - B),))
    targets2d = targets.astype(jnp.int32).reshape(b_pad, 1)

    kernel = functools.partial(
        _ce_label_smooth_kernel,
        epsilon=eps,
        num_classes=num_classes,
        true_b=B,
        block_b=block_b,
    )

    per_row = pl.pallas_call(
        kernel,
        out_shape=jax.ShapeDtypeStruct((b_pad, 1), jnp.float32),
        grid=(num_tiles,),
        in_specs=[
            pl.BlockSpec((block_b, K), lambda i: (i, 0)),   # logits tile
            pl.BlockSpec((block_b, 1), lambda i: (i, 0)),   # targets tile
        ],
        out_specs=pl.BlockSpec((block_b, 1), lambda i: (i, 0)),
        compiler_params=pltpu.CompilerParams(
            dimension_semantics=("parallel",),              # megacore-friendly on v7x
        ),
    )(inputs, targets2d)

    # Final tiny reduction + mean-over-batch in JAX (padded rows are zero).
    return jnp.sum(per_row) / B


def _reference(logits, targets, num_classes, epsilon):
    lp = jax.nn.log_softmax(logits.astype(jnp.float32), axis=1)
    onehot = jax.nn.one_hot(targets, num_classes, dtype=jnp.float32)
    sm = (1.0 - epsilon) * onehot + epsilon / num_classes
    return jnp.sum(jnp.mean(-sm * lp, axis=0))


if __name__ == "__main__":
    key = jax.random.PRNGKey(0)

    # --- test 1: small f32 problem (single tile path) ----------------------
    B1, K1 = 8, 32
    k1, k2, k3, k4 = jax.random.split(key, 4)
    logits1 = jax.random.normal(k1, (B1, K1), dtype=jnp.float32)
    targets1 = jax.random.randint(k2, (B1,), 0, K1, dtype=jnp.int32)

    loss1 = cross_entropy_loss(
        logits1, targets1, num_classes=K1, epsilon=0.1, label_smooth=True
    )
    jax.block_until_ready(loss1)
    ref1 = _reference(logits1, targets1, K1, 0.1)
    assert jnp.allclose(loss1, ref1, atol=1e-5, rtol=1e-5), (loss1, ref1)

    # --- test 2: bf16 logits, multi-tile grid with ragged batch tail -------
    B2, K2 = 200, 384
    logits2 = jax.random.normal(k3, (B2, K2), dtype=jnp.float32).astype(jnp.bfloat16)
    targets2 = jax.random.randint(k4, (B2,), 0, K2, dtype=jnp.int32)

    loss2 = cross_entropy_loss(
        logits2, targets2, num_classes=K2, epsilon=0.1, label_smooth=True, block_b=64
    )
    jax.block_until_ready(loss2)
    ref2 = _reference(logits2, targets2, K2, 0.1)
    assert jnp.allclose(loss2, ref2, atol=1e-4, rtol=1e-4), (loss2, ref2)

    # label_smooth=False path (epsilon forced to 0)
    loss3 = cross_entropy_loss(
        logits1, targets1, num_classes=K1, epsilon=0.1, label_smooth=False
    )
    jax.block_until_ready(loss3)
    ref3 = _reference(logits1, targets1, K1, 0.0)
    assert jnp.allclose(loss3, ref3, atol=1e-5, rtol=1e-5), (loss3, ref3)

    print("KERNEL_OK")
</pallas_src>

<mosaic_0001>
module attributes {stable_mosaic.version = 11 : i64} {
  func.func @_ce_label_smooth_kernel(%arg0: i32, %arg1: memref<8x32xf32, #tpu.memory_space<vmem>>, %arg2: memref<8x1xi32, #tpu.memory_space<vmem>>, %arg3: memref<8x1xf32, #tpu.memory_space<vmem>>) attributes {dimension_semantics = [#tpu.dimension_semantics<parallel>], iteration_bounds = array<i64: 1>, scalar_prefetch = 0 : i64, scratch_operands = 0 : i64, tpu.core_type = #tpu.core_type<tc>, window_params = [{transform_indices = @transform_0, window_bounds = array<i64: 8, 32>}, {transform_indices = @transform_1, window_bounds = array<i64: 8, 1>}, {transform_indices = @transform_2, window_bounds = array<i64: 8, 1>}]} {
    %c0 = arith.constant 0 : index
    %c0_0 = arith.constant 0 : index
    %0 = vector.load %arg1[%c0, %c0_0] : memref<8x32xf32, #tpu.memory_space<vmem>>, vector<8x32xf32>
    %cst = arith.constant dense<0xFF800000> : vector<8xf32>
    %1 = vector.multi_reduction <maximumf>, %0, %cst [1] : vector<8x32xf32> to vector<8xf32>
    %2 = vector.shape_cast %1 : vector<8xf32> to vector<8x1xf32>
    %3 = vector.broadcast %2 : vector<8x1xf32> to vector<8x32xf32>
    %4 = arith.subf %0, %3 : vector<8x32xf32>
    %5 = math.exp %4 : vector<8x32xf32>
    %cst_1 = arith.constant dense<0.000000e+00> : vector<8xf32>
    %6 = vector.multi_reduction <add>, %5, %cst_1 [1] : vector<8x32xf32> to vector<8xf32>
    %7 = vector.shape_cast %6 : vector<8xf32> to vector<8x1xf32>
    %8 = math.log %7 : vector<8x1xf32>
    %cst_2 = arith.constant dense<0.000000e+00> : vector<8xf32>
    %9 = vector.multi_reduction <add>, %4, %cst_2 [1] : vector<8x32xf32> to vector<8xf32>
    %10 = vector.shape_cast %9 : vector<8xf32> to vector<8x1xf32>
    %cst_3 = arith.constant 3.200000e+01 : f32
    %11 = vector.broadcast %cst_3 : f32 to vector<8x1xf32>
    %12 = arith.mulf %11, %8 : vector<8x1xf32>
    %13 = arith.subf %10, %12 : vector<8x1xf32>
    %14 = tpu.iota {dimensions = array<i32: 1>} : vector<8x32xi32>
    %c0_4 = arith.constant 0 : index
    %c0_5 = arith.constant 0 : index
    %15 = vector.load %arg2[%c0_4, %c0_5] : memref<8x1xi32, #tpu.memory_space<vmem>>, vector<8x1xi32>
    %16 = vector.broadcast %15 : vector<8x1xi32> to vector<8x32xi32>
    %17 = arith.cmpi eq, %14, %16 : vector<8x32xi32>
    %cst_6 = arith.constant 0.000000e+00 : f32
    %18 = vector.broadcast %cst_6 : f32 to vector<8x32xf32>
    %19 = arith.select %17, %4, %18 : vector<8x32xi1>, vector<8x32xf32>
    %cst_7 = arith.constant dense<0.000000e+00> : vector<8xf32>
    %20 = vector.multi_reduction <add>, %19, %cst_7 [1] : vector<8x32xf32> to vector<8xf32>
    %21 = vector.shape_cast %20 : vector<8xf32> to vector<8x1xf32>
    %22 = arith.subf %21, %8 : vector<8x1xf32>
    %cst_8 = arith.constant 0.899999976 : f32
    %23 = vector.broadcast %cst_8 : f32 to vector<8x1xf32>
    %24 = arith.mulf %23, %22 : vector<8x1xf32>
    %cst_9 = arith.constant 3.125000e-03 : f32
    %25 = vector.broadcast %cst_9 : f32 to vector<8x1xf32>
    %26 = arith.mulf %25, %13 : vector<8x1xf32>
    %27 = arith.addf %24, %26 : vector<8x1xf32>
    %cst_10 = arith.constant 0.000000e+00 : f32
    %28 = vector.broadcast %cst_10 : f32 to vector<8x1xf32>
    %29 = arith.subf %28, %27 : vector<8x1xf32>
    %c8_i32 = arith.constant 8 : i32
    %30 = arith.muli %arg0, %c8_i32 : i32
    %31 = tpu.iota {dimensions = array<i32: 0>} : vector<8x1xi32>
    %32 = vector.broadcast %30 : i32 to vector<8x1xi32>
    %33 = arith.addi %32, %31 : vector<8x1xi32>
    %c8_i32_11 = arith.constant 8 : i32
    %34 = vector.broadcast %c8_i32_11 : i32 to vector<8x1xi32>
    %35 = arith.cmpi slt, %33, %34 : vector<8x1xi32>
    %cst_12 = arith.constant 0.000000e+00 : f32
    %36 = vector.broadcast %cst_12 : f32 to vector<8x1xf32>
    %37 = arith.select %35, %29, %36 : vector<8x1xi1>, vector<8x1xf32>
    %c0_13 = arith.constant 0 : index
    %c0_14 = arith.constant 0 : index
    %38 = vector.load %arg3[%c0_13, %c0_14] : memref<8x1xf32, #tpu.memory_space<vmem>>, vector<8x1xf32>
    tpu.vector_store %arg3[%c0_13, %c0_14], %37 {strides = array<i32>} : memref<8x1xf32, #tpu.memory_space<vmem>>, vector<8x1xf32>,
    return
  }
  func.func @transform_0(%arg0: i32) -> (i32, i32) {
    %c0_i32 = arith.constant 0 : i32
    %c0_i32_0 = arith.constant 0 : i32
    return %arg0, %c0_i32 : i32, i32
  }
  func.func @transform_1(%arg0: i32) -> (i32, i32) {
    %c0_i32 = arith.constant 0 : i32
    %c0_i32_0 = arith.constant 0 : i32
    return %arg0, %c0_i32 : i32, i32
  }
  func.func @transform_2(%arg0: i32) -> (i32, i32) {
    %c0_i32 = arith.constant 0 : i32
    %c0_i32_0 = arith.constant 0 : i32
    return %arg0, %c0_i32 : i32, i32
  }
}

</mosaic_0001>

<bundles_post_ra>
// kernel: tpu_custom_call.1
= control target key start
LH: loop header
LB: loop body
LE: loop exit
PB: predicated region body
PF: predicated region fallthrough
CT: control target
= control target key end

     0   :  { %vm12_vm0 = vcmask 261120   ;;  %v64_v1 = vmov 0   ;;  %v29_v9 = vlaneseq  ;;  %vm52_vm2 = vcmask 7168   ;;  %s93_s0 = inlined_call_operand.vmem [shape: f32[8,32], index: 0, kind: input, shape index: {}]   ;;  %s94_s1 = inlined_call_operand.vmem [shape: s32[8,1], index: 1, kind: input, shape index: {}]   ;;  %s95_s2 = inlined_call_operand.vmem [shape: f32[8,1], index: 2, kind: output, shape index: {}]  }
   0x1   :  { %v11_v0 = vld [vmem:[%s93_s0] sm:$0xff]  ;;  %59 = vset.pattern.permute.xlu0 %v64_v1 }
   0x2   :  { %v13_v2 = vsel %vm12_vm0, %v11_v0, -inf  ;;  %v31_v3 = vld [vmem:[%s94_s1] sm:$0xff]  ;;  %v30_v10 = vand.u32 127, %v29_v9 }
   0x3   :  { %14 = vmax.xlane.f32.xlu0 %v13_v2 }
  0x17   :  { %33 = vperm.xlu0 %59, %v31_v3  }
  0x76   :  { %v15_v4 = vpop.xlane.xlu0 %14 }
  0x77   :  { %v16_v5 = vsub.f32 %v11_v0, %v15_v4 }
  0x79   :  { %v17_v6 = vmul.f32 1.442695, %v16_v5  ;;  %v24_v12 = vsel %vm12_vm0, %v16_v5, 0.0 }
  0x7b   :  { %60 = vpow2.f32 %v17_v6 }
  0x81   :  { %v61_v7 = vpop.eup %60 }
  0x82   :  { %v19_v8 = vsel %vm12_vm0, %v61_v7, 0.0 }
  0x83   :  { %20 = vadd.xlane.f32.xlu1 %v19_v8 }
  0x89   :  { %v34_v11 = vpop.permute.xlu0 %33 }
  0x8a   :  { %vm35_vm1 = vcmp.eq.s32.totalorder %v30_v10, %v34_v11 }
  0x8b   :  { %25 = vadd.xlane.f32.xlu1 %v24_v12  ;;  %v36_v13 = vsel %vm35_vm1, %v16_v5, 0.0 }
  0x8c   :  { %v37_v14 = vsel %vm12_vm0, %v36_v13, 0.0 }
  0x8d   :  { %38 = vadd.xlane.f32.xlu2 %v37_v14 }
  0xf6   :  { %v21_v15 = vpop.xlane.xlu1 %20 }
  0xf7   :  { %62 = vlog2.f32 %v21_v15 }
  0xfd   :  { %v63_v16 = vpop.eup %62 }
  0xfe   :  { %v23_v17 = vmul.f32 0.6931472, %v63_v16  ;;  %v26_v20 = vpop.xlane.xlu1 %25 }
 0x100   :  { %v27_v18 = vmul.f32 32.0, %v23_v17  ;;  %v39_v19 = vpop.xlane.xlu2 %38 }
 0x101   :  { %v40_v21 = vsub.f32 %v39_v19, %v23_v17 }
 0x102   :  { %v28_v22 = vsub.f32 %v26_v20, %v27_v18 }
 0x103   :  { %v41_v23 = vmul.f32 0.9, %v40_v21 }
 0x104   :  { %v42_v24 = vmul.f32 0.003125, %v28_v22 }
 0x106   :  { %v43_v25 = vadd.f32 %v42_v24, %v41_v23 }
 0x108   :  { %v44_v26 = vsub.f32 0.0, %v43_v25 }
 0x10a   :  { %53 = vst.msk [vmem:[%s95_s2] sm:$0xff] %vm52_vm2, %v44_v26 }

</bundles_post_ra>
